<compile_context>
chip_gen: v5e
topology: v5e:2x2
jax: 0.10.0
libtpu: 0.0.40
codegen_flags: <defaults>
</compile_context>

<pallas_src>
import jax
import jax.numpy as jnp
from jax import lax
from jax.experimental import pallas as pl
from jax.experimental.pallas import tpu as pltpu


def _round_up(a: int, b: int) -> int:
    return ((a + b - 1) // b) * b


def _pick_tile(dim: int, pref: int, align: int, max_waste: float = 1.15) -> int:
    """Largest `align`-multiple tile <= pref (clamped to the padded dim) whose
    padding waste stays under `max_waste`; never below `align`."""
    t = min(pref, _round_up(dim, align))
    t = max(align, (t // align) * align)
    while t > align and _round_up(dim, t) > max_waste * dim:
        t -= align
    return t


def _dot_sim_kernel_f32(inv_temp_ref, x_ref, y_ref, o_ref):
    """out_dtype == f32: accumulate directly into the resident output tile."""
    k = pl.program_id(2)

    @pl.when(k == 0)
    def _init():
        o_ref[...] = jnp.zeros_like(o_ref)

    # A @ B.T on the MXU: contract the last dim of both tiles. No transpose
    # anywhere (neither in the wrapper nor the kernel); output stays lane-dense.
    o_ref[...] += lax.dot_general(
        x_ref[...], y_ref[...],
        dimension_numbers=(((1,), (1,)), ((), ())),
        preferred_element_type=jnp.float32,
    )

    @pl.when(k == pl.num_programs(2) - 1)
    def _scale():
        # Fused /temp as a single VALU multiply on the final k step.
        o_ref[...] = o_ref[...] * inv_temp_ref[0, 0]


def _dot_sim_kernel_acc(inv_temp_ref, x_ref, y_ref, o_ref, acc_ref):
    """Narrower out_dtype: f32 VMEM accumulator, cast on the final store."""
    k = pl.program_id(2)

    @pl.when(k == 0)
    def _init():
        acc_ref[...] = jnp.zeros_like(acc_ref)

    acc_ref[...] += lax.dot_general(
        x_ref[...], y_ref[...],
        dimension_numbers=(((1,), (1,)), ((), ())),
        preferred_element_type=jnp.float32,
    )

    @pl.when(k == pl.num_programs(2) - 1)
    def _store():
        o_ref[...] = (acc_ref[...] * inv_temp_ref[0, 0]).astype(o_ref.dtype)


def dot_similarity(x, y, temp=0.05, *, tm=None, tn=None, tk=None,
                   out_dtype=jnp.float32, compute_dtype=None):
    """Pallas TPU equivalent of Dot_similarity.forward: matmul(x, y.T) / temp.

    compute_dtype: optionally cast inputs (e.g. jnp.bfloat16) for MXU-native
    throughput; accumulation is always f32. None keeps the input dtype.
    """
    M, D = x.shape
    N, Dy = y.shape
    assert D == Dy, "inner dims must match"

    if compute_dtype is not None:
        x = x.astype(compute_dtype)
        y = y.astype(compute_dtype)

    # Tile defaults: lane-dense output (tn multiple of 128), sublane-aligned
    # tm, tk multiple of 128 (up to 1024 for long reductions). Waste-guarded.
    tm = tm if tm is not None else _pick_tile(M, 512, 8)
    tn = tn if tn is not None else _pick_tile(N, 512, 128)
    tk = tk if tk is not None else _pick_tile(D, 1024, 128)

    Mp, Np, Dp = _round_up(M, tm), _round_up(N, tn), _round_up(D, tk)

    # v7x has 2 TensorCores: keep at least one "parallel" grid axis splittable
    # (prefer shrinking tm, then tn) so both cores get work. No-op on v5e/v6e.
    if Mp // tm == 1 and Np // tn == 1:
        new_tm = max(8, ((tm // 2) // 8) * 8)
        if new_tm < tm and _round_up(M, new_tm) // new_tm >= 2:
            tm = new_tm
            Mp = _round_up(M, tm)
        else:
            new_tn = max(128, ((tn // 2) // 128) * 128)
            if new_tn < tn and _round_up(N, new_tn) // new_tn >= 2:
                tn = new_tn
                Np = _round_up(N, tn)

    # Zero-pad to tile multiples (zero K-padding contributes nothing to the dot).
    if (Mp, Dp) != (M, D):
        x = jnp.pad(x, ((0, Mp - M), (0, Dp - D)))
    if (Np, Dp) != (N, D):
        y = jnp.pad(y, ((0, Np - N), (0, Dp - D)))

    # Runtime temperature as an SMEM scalar -> no recompile per temp value.
    inv_temp = jnp.full((1, 1), 1.0 / temp, dtype=jnp.float32)

    grid = (Mp // tm, Np // tn, Dp // tk)

    use_scratch = jnp.dtype(out_dtype) != jnp.dtype(jnp.float32)
    kernel = _dot_sim_kernel_acc if use_scratch else _dot_sim_kernel_f32
    scratch_shapes = [pltpu.VMEM((tm, tn), jnp.float32)] if use_scratch else []

    in_bytes = jnp.dtype(x.dtype).itemsize
    out_bytes = jnp.dtype(out_dtype).itemsize
    # Double-buffered pipeline footprint; leave headroom and stay well under
    # v7x's 64 MiB physical VMEM (v5e scoped default is only 16 MiB, so we set
    # the limit explicitly).
    footprint = 2 * (tm * tk * in_bytes + tn * tk * in_bytes + tm * tn * out_bytes)
    if use_scratch:
        footprint += tm * tn * 4
    vmem_limit = min(48 << 20, max(32 << 20, int(footprint * 1.5)))

    cost = pl.CostEstimate(
        flops=2 * Mp * Np * Dp,
        transcendentals=0,
        bytes_accessed=in_bytes * (Mp * Dp + Np * Dp) + out_bytes * Mp * Np,
    )

    out = pl.pallas_call(
        kernel,
        out_shape=jax.ShapeDtypeStruct((Mp, Np), out_dtype),
        grid_spec=pltpu.PrefetchScalarGridSpec(
            num_scalar_prefetch=0,
            grid=grid,
            in_specs=[
                # 1/temp scalar, resident in SMEM for the whole kernel.
                pl.BlockSpec(memory_space=pltpu.MemorySpace.SMEM),
                # x tile: (tm, tk) at block (i, k)
                pl.BlockSpec((tm, tk), lambda i, j, k: (i, k)),
                # y tile: (tn, tk) at block (j, k)  (A @ B.T, no transpose)
                pl.BlockSpec((tn, tk), lambda i, j, k: (j, k)),
            ],
            out_specs=pl.BlockSpec((tm, tn), lambda i, j, k: (i, j)),
            scratch_shapes=scratch_shapes,
        ),
        compiler_params=pltpu.CompilerParams(
            dimension_semantics=("parallel", "parallel", "arbitrary"),
            vmem_limit_bytes=vmem_limit,
        ),
        cost_estimate=cost,
    )(inv_temp, x, y)

    return out[:M, :N]


if __name__ == "__main__":
    temp = 0.05

    # --- Small-shape check (shapes consistent with the module's demo use) ---
    M, N, D = 16, 8, 32
    key = jax.random.PRNGKey(0)
    kx, ky = jax.random.split(key)
    x = jax.random.normal(kx, (M, D), dtype=jnp.float32)
    y = jax.random.normal(ky, (N, D), dtype=jnp.float32)

    out = jax.block_until_ready(dot_similarity(x, y, temp=temp))
    ref = jnp.matmul(x, y.T) / temp
    assert out.shape == (M, N)
    assert jnp.allclose(out, ref, atol=1e-4, rtol=1e-4), "small-shape mismatch"

    # --- Larger, non-tile-aligned check: multi-step grid, K accumulation,
    # padding/slicing and the waste-guarded tile selection. Small-integer
    # inputs keep the result exact regardless of matmul precision defaults. ---
    M2, N2, D2 = 384, 200, 1024
    kx2, ky2 = jax.random.split(jax.random.PRNGKey(1))
    x2 = jax.random.randint(kx2, (M2, D2), -4, 5).astype(jnp.float32)
    y2 = jax.random.randint(ky2, (N2, D2), -4, 5).astype(jnp.float32)

    out2 = jax.block_until_ready(dot_similarity(x2, y2, temp=temp))
    ref2 = jnp.matmul(x2, y2.T) / temp
    assert out2.shape == (M2, N2)
    assert jnp.allclose(out2, ref2, rtol=1e-4, atol=1e-2), "tiled-shape mismatch"

    # --- Opt-in bf16 input path (f32 accumulation): exact for small ints. ---
    out3 = jax.block_until_ready(
        dot_similarity(x2, y2, temp=temp, compute_dtype=jnp.bfloat16)
    )
    assert jnp.allclose(out3, ref2, rtol=1e-4, atol=1e-2), "bf16-path mismatch"

    print("KERNEL_OK")
</pallas_src>

<mosaic_0001>
module attributes {stable_mosaic.version = 11 : i64} {
  func.func @_dot_sim_kernel_f32(%arg0: i32, %arg1: i32, %arg2: i32, %arg3: memref<1x1xf32, #tpu.memory_space<smem>>, %arg4: memref<8x128xf32, #tpu.memory_space<vmem>>, %arg5: memref<128x128xf32, #tpu.memory_space<vmem>>, %arg6: memref<8x128xf32, #tpu.memory_space<vmem>>) attributes {dimension_semantics = [#tpu.dimension_semantics<parallel>, #tpu.dimension_semantics<parallel>, #tpu.dimension_semantics<arbitrary>], iteration_bounds = array<i64: 2, 1, 1>, scalar_prefetch = 0 : i64, scratch_operands = 0 : i64, tpu.core_type = #tpu.core_type<tc>, window_params = [{transform_indices = @transform_0, window_bounds = array<i64: 1, 1>}, {transform_indices = @transform_1, window_bounds = array<i64: 8, 128>}, {transform_indices = @transform_2, window_bounds = array<i64: 128, 128>}, {transform_indices = @transform_3, window_bounds = array<i64: 8, 128>}]} {
    %c0_i32 = arith.constant 0 : i32
    %0 = arith.cmpi eq, %arg2, %c0_i32 : i32
    %1 = arith.extui %0 : i1 to i32
    %c0_i32_0 = arith.constant 0 : i32
    %2 = arith.cmpi ne, %1, %c0_i32_0 : i32
    scf.if %2 {
      %cst_10 = arith.constant 0.000000e+00 : f32
      %12 = vector.broadcast %cst_10 : f32 to vector<8x128xf32>
      %c0_11 = arith.constant 0 : index
      %c0_12 = arith.constant 0 : index
      %13 = vector.load %arg6[%c0_11, %c0_12] : memref<8x128xf32, #tpu.memory_space<vmem>>, vector<8x128xf32>
      tpu.vector_store %arg6[%c0_11, %c0_12], %12 {strides = array<i32>} : memref<8x128xf32, #tpu.memory_space<vmem>>, vector<8x128xf32>,
    } else {
    }
    %c0 = arith.constant 0 : index
    %c0_1 = arith.constant 0 : index
    %3 = vector.load %arg6[%c0, %c0_1] : memref<8x128xf32, #tpu.memory_space<vmem>>, vector<8x128xf32>
    %c0_2 = arith.constant 0 : index
    %c0_3 = arith.constant 0 : index
    %4 = vector.load %arg4[%c0_2, %c0_3] : memref<8x128xf32, #tpu.memory_space<vmem>>, vector<8x128xf32>
    %c0_4 = arith.constant 0 : index
    %c0_5 = arith.constant 0 : index
    %5 = vector.load %arg5[%c0_4, %c0_5] : memref<128x128xf32, #tpu.memory_space<vmem>>, vector<128x128xf32>
    %cst = arith.constant dense<0.000000e+00> : vector<8x128xf32>
    %6 = tpu.matmul %4, %5, %cst {dimension_numbers = #tpu.dot_dimension_numbers<[1], [1], [0], [0], [0, 0, 1, 0], [], []>} : vector<8x128xf32>, vector<128x128xf32>, vector<8x128xf32> -> vector<8x128xf32>
    %7 = arith.addf %3, %6 : vector<8x128xf32>
    %c0_6 = arith.constant 0 : index
    %c0_7 = arith.constant 0 : index
    %8 = vector.load %arg6[%c0_6, %c0_7] : memref<8x128xf32, #tpu.memory_space<vmem>>, vector<8x128xf32>
    tpu.vector_store %arg6[%c0_6, %c0_7], %7 {strides = array<i32>} : memref<8x128xf32, #tpu.memory_space<vmem>>, vector<8x128xf32>,
    %c0_i32_8 = arith.constant 0 : i32
    %9 = arith.cmpi eq, %arg2, %c0_i32_8 : i32
    %10 = arith.extui %9 : i1 to i32
    %c0_i32_9 = arith.constant 0 : i32
    %11 = arith.cmpi ne, %10, %c0_i32_9 : i32
    scf.if %11 {
      %c0_10 = arith.constant 0 : index
      %c0_11 = arith.constant 0 : index
      %12 = vector.load %arg6[%c0_10, %c0_11] : memref<8x128xf32, #tpu.memory_space<vmem>>, vector<8x128xf32>
      %c0_12 = arith.constant 0 : index
      %c0_13 = arith.constant 0 : index
      %13 = memref.load %arg3[%c0_12, %c0_13] : memref<1x1xf32, #tpu.memory_space<smem>>
      %14 = vector.broadcast %13 : f32 to vector<8x128xf32>
      %15 = arith.mulf %12, %14 : vector<8x128xf32>
      %c0_14 = arith.constant 0 : index
      %c0_15 = arith.constant 0 : index
      %16 = vector.load %arg6[%c0_14, %c0_15] : memref<8x128xf32, #tpu.memory_space<vmem>>, vector<8x128xf32>
      tpu.vector_store %arg6[%c0_14, %c0_15], %15 {strides = array<i32>} : memref<8x128xf32, #tpu.memory_space<vmem>>, vector<8x128xf32>,
    } else {
    }
    return
  }
  func.func @transform_0(%arg0: i32, %arg1: i32, %arg2: i32) -> (i32, i32) {
    %c0_i32 = arith.constant 0 : i32
    %c0_i32_0 = arith.constant 0 : i32
    %c0_i32_1 = arith.constant 0 : i32
    return %c0_i32, %c0_i32_0 : i32, i32
  }
  func.func @transform_1(%arg0: i32, %arg1: i32, %arg2: i32) -> (i32, i32) {
    %c0_i32 = arith.constant 0 : i32
    return %arg0, %arg2 : i32, i32
  }
  func.func @transform_2(%arg0: i32, %arg1: i32, %arg2: i32) -> (i32, i32) {
    %c0_i32 = arith.constant 0 : i32
    return %arg1, %arg2 : i32, i32
  }
  func.func @transform_3(%arg0: i32, %arg1: i32, %arg2: i32) -> (i32, i32) {
    %c0_i32 = arith.constant 0 : i32
    return %arg0, %arg1 : i32, i32
  }
}

</mosaic_0001>

<bundles_post_ra>
// kernel: tpu_custom_call.1
= control target key start
LH: loop header
LB: loop body
LE: loop exit
PB: predicated region body
PF: predicated region fallthrough
CT: control target
= control target key end

     0   :  { %s824_s0 = inlined_call_operand.<no memory space> [shape: f32[1,1], index: 0, kind: input, shape index: {}]   ;;  %s825_s1 = inlined_call_operand.hbm [shape: f32[16,128], index: 1, kind: input, shape index: {}]   ;;  %s826_s2 = inlined_call_operand.hbm [shape: f32[128,128], index: 2, kind: input, shape index: {}]   ;;  %s827_s3 = inlined_call_operand.hbm [shape: f32[16,128], index: 3, kind: output, shape index: {}]  }
   0x1   :  { %8 = sst [smem:[#allocation2]] %s824_s0 }
   0x2   :  { %9 = vsyncpa [#allocation4], 0 }
   0x3   :  { %11 = vsyncpa [#allocation4 + $0x1], 0 }
   0x4   :  { %12 = vsyncpa [#allocation7], 0 }
   0x5   :  { %13 = vsyncpa [#allocation5], 0 }
   0x6   :  { %15 = vsyncpa [#allocation5 + $0x1], 0  ;;  %s674_s14 = smov 0   ;;  %s676_s15 = smov 0  }
   0x7   :  { %s678_s16 = smov 0   ;;  %s680_s17 = smov 0  }
   0x8   :  { %s682_s18 = smov 0   ;;  %s684_s19 = smov 0  }
   0x9 LB: > { %s409_s0 = sadd.s32 4294967295, %s646_s19   ;;  %p411_p0 = scmp.ge.s32.totalorder %s646_s19, 1  ;;  %s646_s19 = sphi %s684_s19, %s21_s19   ;;  %s642_s18 = sphi %s682_s18, %s838_s18   ;;  %s638_s17 = sphi %s680_s17, %s837_s17   ;;  %s634_s16 = sphi %s678_s16, %s836_s16   ;;  %s630_s15 = sphi %s676_s15, %s835_s15   ;;  %s626_s14 = sphi %s674_s14, %s834_s14  }
   0xa   : > { %p706_p1 = scmp.eq.s32.totalorder %s409_s0, 0  ;;  %p150_p2 = scmp.lt.s32.totalorder %s646_s19, 3 }
   0xb   : > { %s168_s23 = sshll.u32 %s826_s2, 4  ;;  %s648_s25 = smov [#allocation6]   ;;  %s169_s23 = int_to_ptr.hbm [resolvable:$true] %s168_s23 }
   0xc   : > { %p714_p3 = pnand %p411_p0, %p150_p2  ;;  %s170_s26 = sshll.u32 %s648_s25, 4  ;;  %s171_s26 = int_to_ptr.vmem [resolvable:$true] %s170_s26 }
   0xd   : > { %p413_p6 = scmp.ge.s32.totalorder %s646_s19, 2  ;;  %s649_s27 = smov 128  }
   0xe   : > { %p432_p4 = pneg %p714_p3  ;;  %s650_s28 = smov 8  }
   0xf   : > { %s410_s29 = sadd.s32 4294967294, %s646_s19   ;;  %s40_s30 = sadd.s32 1, %s642_s18 }
  0x10   : > { %p433_p5 = pnand %p432_p4, %p706_p1  ;;  %s70_s4 = sadd.s32 1, %s634_s16 }
  0x11   : > { %p42_p7 = scmp.ge.s32.totalorder %s40_s30, 2  ;;  %p77_p8 = scmp.ne.s32.totalorder %s634_s16, %s630_s15 }
  0x12   : > { %435 = dma.hbm_to_vmem [thread:$0]  (!%p433_p5), %s169_s23, 2048, %s171_s26, [#allocation7], %s649_s27, %s649_s27, %s650_s28  }
  0x13   : > { %p78_p9 = scmp.eq.s32.totalorder %s646_s19, 0  ;;  %p83_p10 = scmp.ne.s32.totalorder %s630_s15, %s626_s14 }
  0x14   : > { %s840_s30 = smov (%p42_p7, %s40_s30), 0  ;;  %p137_p13 = scmp.eq.s32.totalorder %s409_s0, 1 }
  0x15   : > { %p733_p11 = por %p78_p9, %p77_p8  ;;  %p739_p12 = por %p706_p1, %p83_p10 }
  0x16   : > { %s65_s7 = ssub.s32 %s642_s18, %s840_s30  ;;  %p143_p2 = scmp.eq.s32.totalorder %s410_s29, 1 }
  0x17   : > { %p68_p0 = scmp.eq.s32.totalorder %s65_s7, 0  ;;  %p745_p4 = por %p137_p13, %p77_p8 }
  0x18   : > { %p445_p5 = scmp.lt.s32.totalorder %s646_s19, 2  ;;  %p753_p7 = por %p143_p2, %p83_p10 }
  0x19   : > { %s751_s9 = scalar_select %p68_p0, %s634_s16, %s70_s4  }
  0x1a   : > { %s184_s11 = sand.u32 1, %s634_s16   ;;  %s415_s13 = sshll.u32 %s642_s18, 3 }
  0x1b   : > { %s414_s12 = sshll.u32 %s184_s11, 3  ;;  %s193_s0 = scalar_lea.hbm %s825_s1, %s415_s13 }
  0x1c   : > { %s188_s23 = scalar_lea.vmem [#allocation3], %s414_s12  ;;  %s195_s26 = sshll.u32 %s193_s0, 4  ;;  %s196_s26 = int_to_ptr.hbm [resolvable:$true] %s195_s26 }
  0x1d   : > { %s197_s25 = sshll.u32 %s188_s23, 4  ;;  %p437_p8 = pnand %p445_p5, %p733_p11  ;;  %s198_s25 = int_to_ptr.vmem [resolvable:$true] %s197_s25 }
  0x1e   : > { %s185_s27 = scalar_lea.sflag [#allocation4], %s184_s11  ;;  %206 = sbr.rel (%p714_p3) target bundleno = 233 (0xe9), region = 32 }
  0x1f   : > { %439 = dma.hbm_to_vmem [thread:$0]  (!%p437_p8), %s196_s26, 128, %s198_s25, %s185_s27  }
  0x20   : > { %s767_s28 = sand.u32 (!%p714_p3), 1, %s630_s15  }
  0x21   : > { %s417_s29 = sshll.u32 (!%p714_p3), %s767_s28, 3  ;;  %s209_s4 = scalar_lea.sflag (!%p714_p3), [#allocation4], %s767_s28 }
  0x22   : > { %s773_s7 = scalar_lea.vmem (!%p714_p3), [#allocation3], %s417_s29 }
  0x23   : > { %613 = dma.done.wait (%p739_p12), %s209_s4, 128  }
  0x24   : > { %615 = vsyncadd (%p739_p12), %s209_s4, 4294967168 }
  0x25   : > { %617 = dma.done.wait (%p706_p1), [#allocation7], 2048  }
  0x26   : > { %619 = vsyncadd (%p706_p1), [#allocation7], 4294965248  ;;  %v264_v0 = vld [vmem:[#allocation6 + $0x78] sm:$0xff]  ;;  %v263_v1 = vld [vmem:[#allocation6 + $0x70] sm:$0xff]  ;;  %s291_s20 = sld [smem:[#allocation2]]  ;;  %s421_s24 = sshll.u32 %s638_s17, 3 }
  0x27   : > { %265 = vmatpush.xpose.msra.mxu0 %v264_v0  ;;  %v262_v2 = vld [vmem:[#allocation6 + $0x68] sm:$0xff]  ;;  %v261_v3 = vld [vmem:[#allocation6 + $0x60] sm:$0xff]  ;;  %v260_v4 = vld [vmem:[#allocation6 + $0x58] sm:$0xff]  ;;  %s307_s11 = scalar_lea.hbm %s827_s3, %s421_s24  ;;  %s240_s12 = scalar_lea.vmem [#allocation8], %s417_s29 }
  0x28   : > { %v259_v5 = vld [vmem:[#allocation6 + $0x50] sm:$0xff]  ;;  %v258_v6 = vld [vmem:[#allocation6 + $0x48] sm:$0xff]  ;;  %v257_v7 = vld [vmem:[#allocation6 + $0x40] sm:$0xff]  ;;  %s309_s13 = sshll.u32 %s240_s12, 4  ;;  %s311_s21 = sshll.u32 %s307_s11, 4  ;;  %s310_s13 = int_to_ptr.vmem [resolvable:$true] %s309_s13  ;;  %s312_s21 = int_to_ptr.hbm [resolvable:$true] %s311_s21 }
  0x29   : > { %v256_v8 = vld [vmem:[#allocation6 + $0x38] sm:$0xff]  ;;  %v255_v9 = vld [vmem:[#allocation6 + $0x30] sm:$0xff]  ;;  %v254_v10 = vld [vmem:[#allocation6 + $0x28] sm:$0xff]  ;;  %s296_s22 = scalar_lea.sflag [#allocation5], %s767_s28  ;;  %s574_s0 = sshra.s32 %s312_s21, 4  ;;  %s575_s0 = int_to_ptr.hbm [resolvable:$true] %s574_s0 }
  0x2a   : > { %v253_v11 = vld [vmem:[#allocation6 + $0x20] sm:$0xff]  ;;  %v252_v12 = vld [vmem:[#allocation6 + $0x18] sm:$0xff]  ;;  %v251_v13 = vld [vmem:[#allocation6 + $0x10] sm:$0xff]  ;;  %s576_s23 = scalar_lea.hbm %s575_s0, 8  ;;  %s580_s26 = scalar_lea.hbm %s827_s3, 16 }
  0x2b   : > { %266 = vmatpush.xpose.msra.mxu0 %v263_v1  ;;  %v250_v14 = vld [vmem:[#allocation6 + $0x8] sm:$0xff]  ;;  %v249_v15 = vld [vmem:[#allocation6] sm:$0xff]  ;;  %v248_v16 = vld [vmem:[%s773_s7] sm:$0xff]  ;;  %p577_p1 = scmp.ne.s32.totalorder %s575_s0, %s576_s23  ;;  %p581_p10 = scmp.lt.s32.totalorder %s575_s0, %s827_s3 }
  0x2c   : > { %v292_v18 = vstv %s291_s20  ;;  %p582_p11 = scmp.lt.s32.totalorder %s580_s26, %s576_s23 }
  0x2d   : > { %p578_p3 = pnand %p577_p1, %p745_p4 }
  0x2e   : > { %p583_p12 = por %p582_p11, %p581_p10 }
  0x2f   : > { %267 = vmatpush.xpose.msra.mxu0 %v262_v2  ;;  %p579_p9 = pneg %p578_p3 }
  0x31   : > { %p584_p13 = pnand %p583_p12, %p579_p9 }
  0x33   : > { %268 = vmatpush.xpose.msra.mxu0 %v261_v3 }
  0x37   : > { %269 = vmatpush.xpose.msra.mxu0 %v260_v4 }
  0x3b   : > { %270 = vmatpush.xpose.msra.mxu0 %v259_v5 }
  0x3f   : > { %271 = vmatpush.xpose.msra.mxu0 %v258_v6 }
  0x43   : > { %272 = vmatpush.xpose.msra.mxu0 %v257_v7 }
  0x47   : > { %273 = vmatpush.xpose.msra.mxu0 %v256_v8 }
  0x4b   : > { %274 = vmatpush.xpose.msra.mxu0 %v255_v9 }
  0x4f   : > { %275 = vmatpush.xpose.msra.mxu0 %v254_v10 }
  0x53   : > { %276 = vmatpush.xpose.msra.mxu0 %v253_v11 }
  0x57   : > { %277 = vmatpush.xpose.msra.mxu0 %v252_v12 }
  0x5b   : > { %278 = vmatpush.xpose.msra.mxu0 %v251_v13 }
  0x5f   : > { %279 = vmatpush.xpose.msra.mxu0 %v250_v14 }
  0x63   : > { %280 = vmatpush.xpose.msra.mxu0 %v249_v15 }
  0x66   : > { %281 = vmatmul.f32.vlgmr.msra.gmra.mxu0 %v248_v16 }
  0xe3   : > { %v282_v17 = vpop.f32.mrf.mxu0 }
  0xe4   : > { %v293_v19 = vmul.f32 %v292_v18, %v282_v17 }
  0xe6   : > { %294 = vst [vmem:[%s240_s12] sm:$0xff] %v293_v19 }
  0xe7   : > { %587 = shalt.err (!%p584_p13)
}
  0xe8   : > { %430 = dma.vmem_to_hbm [thread:$0]  (%p745_p4), %s310_s13, 128, %s312_s21, %s296_s22  }
  0xe9 PF: > { %s323_s28 = sand.u32 1, %s626_s14   ;;  %p441_p0 = pnand %p413_p6, %p753_p7 }
  0xea   : > { %s324_s4 = scalar_lea.sflag [#allocation5], %s323_s28 }
  0xeb   : > { %p442_p2 = pneg %p441_p0 }
  0xed   : > { %621 = dma.done.wait (%p442_p2), %s324_s4, 128  }
  0xee   : > { %623 = vsyncadd (%p442_p2), %s324_s4, 4294967168  ;;  %s21_s19 = sadd.s32 1, %s646_s19   ;;  %s834_s14 = smov %s630_s15 }
  0xef   : > { %p18_p5 = scmp.ge.s32.totalorder %s21_s19, 4   ;;  %s835_s15 = smov %s634_s16 }
  0xf0   : > { %s836_s16 = smov %s751_s9  ;;  %s837_s17 = smov %s642_s18 }
  0xf1   : > { %s838_s18 = smov %s840_s30  ;;  %20 = sbr.rel (!%p18_p5) target bundleno = 9 (0x9), region = 90 }
  0xf6   :  { %330 = vsyncpa [#allocation4], 1 }
  0xf7   :  { %332 = vsyncpa [#allocation4 + $0x1], 1 }
  0xf8   :  { %333 = vsyncpa [#allocation7], 1 }
  0xf9   :  { %334 = vsyncpa [#allocation5], 1 }
  0xfa   :  { %336 = vsyncpa [#allocation5 + $0x1], 1 }

</bundles_post_ra>
